<compile_context>
chip_gen: v6e
topology: v6e:2x2x1
jax: 0.10.0
libtpu: 0.0.40
codegen_flags: <defaults>
</compile_context>

<pallas_src>
import functools
import math

import jax
import jax.numpy as jnp
from jax import lax
from jax.experimental import pallas as pl
from jax.experimental.pallas import tpu as pltpu


# ----------------------------- helpers (plain JAX glue) -----------------------------

def _interp_matrix(n_in: int, n_out: int) -> jnp.ndarray:
    """Row-interpolation matrix M (n_out, n_in) for bilinear, align_corners=True."""
    idx = jnp.arange(n_out, dtype=jnp.float32)
    if n_out > 1:
        src = idx * (n_in - 1) / (n_out - 1)
    else:
        src = jnp.zeros((n_out,), jnp.float32)
    p0 = jnp.clip(jnp.floor(src).astype(jnp.int32), 0, n_in - 1)
    p1 = jnp.clip(p0 + 1, 0, n_in - 1)
    w1 = src - p0.astype(jnp.float32)
    w0 = 1.0 - w1
    m = jnp.zeros((n_out, n_in), jnp.float32)
    rows = jnp.arange(n_out)
    m = m.at[rows, p0].add(w0)
    m = m.at[rows, p1].add(w1)
    return m


def _pick_vmem_limit_bytes() -> int:
    """~3/4 of physical VMEM, capped at 96 MiB (conservative fallback: 48 MiB)."""
    cap = 64 * 1024 * 1024
    try:
        cap = int(pltpu.get_tpu_info().vmem_capacity_bytes)
    except Exception:
        pass
    return int(min(96 * 1024 * 1024, (3 * cap) // 4))


# ----------------------------- Pallas kernel -----------------------------

def _make_segblock_kernel(H, W, C_in, C_out, upsample):
    HW = H * W
    Ho, Wo = 2 * H, 2 * W

    def kernel(*refs):
        if upsample:
            x_ref, w_ref, sc_ref, sh_ref, wmap_ref, bt_ref, o_ref = refs
        else:
            x_ref, w_ref, sc_ref, sh_ref, wmap_ref, o_ref = refs

        # x block: (1, C_in, H*W), spatial flattened on the lane axis.
        xf = x_ref[0].astype(jnp.float32)                     # (C_in, HW)

        # In-kernel padding masks: flat index + column-in-row index (no mask DMA).
        col = lax.broadcasted_iota(jnp.int32, (1, HW), 1)     # (1, HW) flat index
        ww = wmap_ref[...]                                    # (1, HW) == col % W

        # 3x3 conv = 9 accumulating (C_out, C_in) @ (C_in, HW) MXU matmuls.
        # Each tap is an XLU lane roll of the flat image + an edge-validity mask
        # (implicit zero padding); taps/weights are cast to bf16 for the MXU,
        # accumulation stays f32.
        acc = jnp.zeros((C_out, HW), jnp.float32)
        t = 0
        for dy in (-1, 0, 1):
            for dx in (-1, 0, 1):
                s = dy * W + dx                               # flat-index shift
                tap = xf if s == 0 else pltpu.roll(xf, shift=(-s) % HW, axis=1)
                if dy != 0 or dx != 0:
                    valid = None
                    if dy == -1:
                        valid = col >= W                      # h - 1 >= 0
                    elif dy == 1:
                        valid = col < (H - 1) * W             # h + 1 <= H-1
                    if dx == -1:
                        v = ww >= 1                           # w - 1 >= 0
                        valid = v if valid is None else (valid & v)
                    elif dx == 1:
                        v = ww <= W - 2                       # w + 1 <= W-1
                        valid = v if valid is None else (valid & v)
                    tap = tap * valid.astype(jnp.float32)     # implicit zero pad
                acc = acc + jnp.dot(w_ref[t], tap.astype(jnp.bfloat16),
                                    preferred_element_type=jnp.float32)
                t += 1

        # Fused BatchNorm (eval-mode affine, (C_out,1) sublane broadcast) + ReLU.
        y = jnp.maximum(acc * sc_ref[...] + sh_ref[...], 0.0)  # (C_out, HW) f32

        if not upsample:
            o_ref[0] = y.astype(o_ref.dtype)                  # lane-dense slab
            return

        # Fused separable bilinear x2 upsample (align_corners=True):
        #  1) W-interp: per-source-row matmul on static lane slices (MXU,
        #     channels fill the M dimension).
        rows = [jnp.dot(y[:, h * W:(h + 1) * W], bt_ref[...],
                        preferred_element_type=jnp.float32)    # (C_out, Wo)
                for h in range(H)]
        #  2) H-interp: <=2 source rows per output row with compile-time
        #     weights -> pure VPU lerp, no per-channel loop, no tiny matmuls.
        pieces = []
        for p in range(Ho):
            src = p * (H - 1) / (Ho - 1) if Ho > 1 else 0.0
            h0 = min(int(math.floor(src)), H - 1)
            h1 = min(h0 + 1, H - 1)
            a1 = src - h0
            if a1 == 0.0 or h1 == h0:
                pieces.append(rows[h0])
            else:
                pieces.append((1.0 - a1) * rows[h0] + a1 * rows[h1])
        out = jnp.concatenate(pieces, axis=1)                  # (C_out, Ho*Wo)
        o_ref[0] = out.astype(o_ref.dtype)                     # lane-dense slab

    return kernel


# ----------------------------- wrapper -----------------------------

@functools.partial(jax.jit, static_argnames=("upsample",))
def seg_block_pallas(x_nchw, w_oihw, gamma, beta, run_mean, run_var,
                     *, upsample: bool, eps: float = 1e-5):
    N, C_in, H, W = x_nchw.shape
    C_out = w_oihw.shape[0]
    HW = H * W

    # Free reshape (contiguous-dim merge): NCHW -> (N, C_in, H*W).
    x_flat = x_nchw.reshape(N, C_in, HW).astype(jnp.float32)

    # Conv weight (C_out, C_in, 3, 3) -> (9, C_out, C_in), tap-major, bf16 for
    # the MXU (tiny; no extra HBM pass on the activations).
    wtaps = jnp.transpose(w_oihw, (2, 3, 0, 1)).reshape(9, C_out, C_in)
    wtaps = wtaps.astype(jnp.bfloat16)

    # Fused BN affine from running stats, shaped for sublane broadcast.
    inv_std = 1.0 / jnp.sqrt(run_var.astype(jnp.float32) + eps)
    scale = (gamma.astype(jnp.float32) * inv_std).reshape(C_out, 1)
    shift = (beta.astype(jnp.float32)
             - run_mean.astype(jnp.float32) * gamma.astype(jnp.float32) * inv_std
             ).reshape(C_out, 1)

    # Column-in-row index map (1, HW): lets the kernel build all 9 padding masks
    # from comparisons (replaces the old (9,1,HW) f32 mask DMA).
    wmap = jnp.tile(jnp.arange(W, dtype=jnp.int32), H).reshape(1, HW)

    cparams = pltpu.CompilerParams(
        dimension_semantics=("parallel",),
        vmem_limit_bytes=_pick_vmem_limit_bytes())

    kernel = _make_segblock_kernel(H, W, C_in, C_out, upsample)

    common_in_specs = [
        pl.BlockSpec((1, C_in, HW), lambda n: (n, 0, 0)),
        pl.BlockSpec((9, C_out, C_in), lambda n: (0, 0, 0)),
        pl.BlockSpec((C_out, 1), lambda n: (0, 0)),
        pl.BlockSpec((C_out, 1), lambda n: (0, 0)),
        pl.BlockSpec((1, HW), lambda n: (0, 0)),
    ]

    if not upsample:
        y_flat = pl.pallas_call(
            kernel,
            out_shape=jax.ShapeDtypeStruct((N, C_out, HW), jnp.float32),
            grid=(N,),
            in_specs=common_in_specs,
            out_specs=pl.BlockSpec((1, C_out, HW), lambda n: (n, 0, 0)),
            compiler_params=cparams,
        )(x_flat, wtaps, scale, shift, wmap)
        # Free reshape back to NCHW.
        return y_flat.reshape(N, C_out, H, W)

    Ho, Wo = 2 * H, 2 * W
    bt = _interp_matrix(W, Wo).T                         # (W, 2W), f32
    out_flat = pl.pallas_call(
        kernel,
        out_shape=jax.ShapeDtypeStruct((N, C_out, Ho * Wo), jnp.float32),
        grid=(N,),
        in_specs=common_in_specs + [pl.BlockSpec((W, Wo), lambda n: (0, 0))],
        out_specs=pl.BlockSpec((1, C_out, Ho * Wo), lambda n: (n, 0, 0)),
        compiler_params=cparams,
    )(x_flat, wtaps, scale, shift, wmap, bt)
    # Free reshape back to NCHW.
    return out_flat.reshape(N, C_out, Ho, Wo)


# ----------------------------- pure-JAX reference -----------------------------

def seg_block_ref(x_nchw, w_oihw, gamma, beta, run_mean, run_var,
                  *, upsample: bool, eps: float = 1e-5):
    y = lax.conv_general_dilated(
        x_nchw, w_oihw, window_strides=(1, 1), padding=((1, 1), (1, 1)),
        dimension_numbers=("NCHW", "OIHW", "NCHW"))
    inv = 1.0 / jnp.sqrt(run_var + eps)
    sc = (gamma * inv)[None, :, None, None]
    sh = (beta - run_mean * gamma * inv)[None, :, None, None]
    y = jnp.maximum(y * sc + sh, 0.0)
    if upsample:
        _, _, H, W = y.shape
        A = _interp_matrix(H, 2 * H)
        B = _interp_matrix(W, 2 * W)
        y = jnp.einsum("ph,nchw,qw->ncpq", A, y, B)
    return y


# ----------------------------- main -----------------------------

if __name__ == "__main__":
    key = jax.random.PRNGKey(0)
    k1, k2, k3, k4, k5, k6 = jax.random.split(key, 6)

    N, C_in, C_out, H, W = 2, 4, 8, 16, 16

    x = jax.random.normal(k1, (N, C_in, H, W), jnp.float32)
    w = jax.random.normal(k2, (C_out, C_in, 3, 3), jnp.float32) * 0.1
    gamma = jax.random.uniform(k3, (C_out,), jnp.float32, 0.5, 1.5)
    beta = jax.random.normal(k4, (C_out,), jnp.float32) * 0.1
    run_mean = jax.random.normal(k5, (C_out,), jnp.float32) * 0.1
    run_var = jax.random.uniform(k6, (C_out,), jnp.float32, 0.5, 1.5)

    ok = True
    for upsample in (False, True):
        out = jax.block_until_ready(
            seg_block_pallas(x, w, gamma, beta, run_mean, run_var,
                             upsample=upsample))
        ref = jax.block_until_ready(
            seg_block_ref(x, w, gamma, beta, run_mean, run_var,
                          upsample=upsample))
        assert out.shape == ref.shape, (out.shape, ref.shape)
        # bf16 MXU inputs (f32 accumulation) -> loosened tolerance vs f32 ref.
        if not jnp.allclose(out, ref, rtol=2e-2, atol=2e-2):
            ok = False
            print("MISMATCH upsample=", upsample,
                  float(jnp.max(jnp.abs(out - ref))))

    if ok:
        print("KERNEL_OK")
</pallas_src>

<mosaic_0001>
module attributes {stable_mosaic.version = 11 : i64} {
  func.func @kernel(%arg0: i32, %arg1: memref<1x4x256xf32, #tpu.memory_space<vmem>>, %arg2: memref<9x8x4xbf16, #tpu.memory_space<vmem>>, %arg3: memref<8x1xf32, #tpu.memory_space<vmem>>, %arg4: memref<8x1xf32, #tpu.memory_space<vmem>>, %arg5: memref<1x256xi32, #tpu.memory_space<vmem>>, %arg6: memref<1x8x256xf32, #tpu.memory_space<vmem>>) attributes {dimension_semantics = [#tpu.dimension_semantics<parallel>], iteration_bounds = array<i64: 2>, scalar_prefetch = 0 : i64, scratch_operands = 0 : i64, tpu.core_type = #tpu.core_type<tc>, window_params = [{transform_indices = @transform_0, window_bounds = array<i64: 1, 4, 256>}, {pipeline_mode = #tpu.pipeline_mode<synchronous>, transform_indices = @transform_1, window_bounds = array<i64: 9, 8, 4>}, {pipeline_mode = #tpu.pipeline_mode<synchronous>, transform_indices = @transform_2, window_bounds = array<i64: 8, 1>}, {pipeline_mode = #tpu.pipeline_mode<synchronous>, transform_indices = @transform_3, window_bounds = array<i64: 8, 1>}, {pipeline_mode = #tpu.pipeline_mode<synchronous>, transform_indices = @transform_4, window_bounds = array<i64: 1, 256>}, {transform_indices = @transform_5, window_bounds = array<i64: 1, 8, 256>}]} {
    %c0 = arith.constant 0 : index
    %c0_0 = arith.constant 0 : index
    %c0_1 = arith.constant 0 : index
    %0 = vector.load %arg1[%c0, %c0_0, %c0_1] : memref<1x4x256xf32, #tpu.memory_space<vmem>>, vector<1x4x256xf32>
    %1 = vector.shape_cast %0 : vector<1x4x256xf32> to vector<4x256xf32>
    %2 = tpu.iota {dimensions = array<i32: 1>} : vector<1x256xi32>
    %c0_2 = arith.constant 0 : index
    %c0_3 = arith.constant 0 : index
    %3 = vector.load %arg5[%c0_2, %c0_3] : memref<1x256xi32, #tpu.memory_space<vmem>>, vector<1x256xi32>
    %cst = arith.constant 0.000000e+00 : f32
    %4 = vector.broadcast %cst : f32 to vector<8x256xf32>
    %c17_i32 = arith.constant 17 : i32
    %5 = tpu.dynamic_rotate %1 by %c17_i32 dim 1 : vector<4x256xf32>, i32 -> vector<4x256xf32>
    %c16_i32 = arith.constant 16 : i32
    %6 = vector.broadcast %c16_i32 : i32 to vector<1x256xi32>
    %7 = arith.cmpi sge, %2, %6 : vector<1x256xi32>
    %c1_i32 = arith.constant 1 : i32
    %8 = vector.broadcast %c1_i32 : i32 to vector<1x256xi32>
    %9 = arith.cmpi sge, %3, %8 : vector<1x256xi32>
    %10 = arith.andi %7, %9 : vector<1x256xi1>
    %11 = arith.extui %10 : vector<1x256xi1> to vector<1x256xi32>
    %12 = arith.sitofp %11 : vector<1x256xi32> to vector<1x256xf32>
    %13 = vector.broadcast %12 : vector<1x256xf32> to vector<4x256xf32>
    %14 = arith.mulf %5, %13 : vector<4x256xf32>
    %c0_4 = arith.constant 0 : index
    %c0_5 = arith.constant 0 : index
    %c0_6 = arith.constant 0 : index
    %15 = vector.load %arg2[%c0_4, %c0_5, %c0_6] : memref<9x8x4xbf16, #tpu.memory_space<vmem>>, vector<1x8x4xbf16>
    %16 = vector.shape_cast %15 : vector<1x8x4xbf16> to vector<8x4xbf16>
    %17 = arith.truncf %14 : vector<4x256xf32> to vector<4x256xbf16>
    %cst_7 = arith.constant dense<0.000000e+00> : vector<8x256xf32>
    %18 = tpu.matmul %16, %17, %cst_7 {dimension_numbers = #tpu.dot_dimension_numbers<[1], [0], [0], [1], [0, 0, 1, 1], [], []>} : vector<8x4xbf16>, vector<4x256xbf16>, vector<8x256xf32> -> vector<8x256xf32>
    %19 = arith.addf %4, %18 : vector<8x256xf32>
    %c16_i32_8 = arith.constant 16 : i32
    %20 = tpu.dynamic_rotate %1 by %c16_i32_8 dim 1 : vector<4x256xf32>, i32 -> vector<4x256xf32>
    %c16_i32_9 = arith.constant 16 : i32
    %21 = vector.broadcast %c16_i32_9 : i32 to vector<1x256xi32>
    %22 = arith.cmpi sge, %2, %21 : vector<1x256xi32>
    %23 = arith.extui %22 : vector<1x256xi1> to vector<1x256xi32>
    %24 = arith.sitofp %23 : vector<1x256xi32> to vector<1x256xf32>
    %25 = vector.broadcast %24 : vector<1x256xf32> to vector<4x256xf32>
    %26 = arith.mulf %20, %25 : vector<4x256xf32>
    %c1 = arith.constant 1 : index
    %c0_10 = arith.constant 0 : index
    %c0_11 = arith.constant 0 : index
    %27 = vector.load %arg2[%c1, %c0_10, %c0_11] : memref<9x8x4xbf16, #tpu.memory_space<vmem>>, vector<1x8x4xbf16>
    %28 = vector.shape_cast %27 : vector<1x8x4xbf16> to vector<8x4xbf16>
    %29 = arith.truncf %26 : vector<4x256xf32> to vector<4x256xbf16>
    %cst_12 = arith.constant dense<0.000000e+00> : vector<8x256xf32>
    %30 = tpu.matmul %28, %29, %cst_12 {dimension_numbers = #tpu.dot_dimension_numbers<[1], [0], [0], [1], [0, 0, 1, 1], [], []>} : vector<8x4xbf16>, vector<4x256xbf16>, vector<8x256xf32> -> vector<8x256xf32>
    %31 = arith.addf %19, %30 : vector<8x256xf32>
    %c15_i32 = arith.constant 15 : i32
    %32 = tpu.dynamic_rotate %1 by %c15_i32 dim 1 : vector<4x256xf32>, i32 -> vector<4x256xf32>
    %c16_i32_13 = arith.constant 16 : i32
    %33 = vector.broadcast %c16_i32_13 : i32 to vector<1x256xi32>
    %34 = arith.cmpi sge, %2, %33 : vector<1x256xi32>
    %c14_i32 = arith.constant 14 : i32
    %35 = vector.broadcast %c14_i32 : i32 to vector<1x256xi32>
    %36 = arith.cmpi sle, %3, %35 : vector<1x256xi32>
    %37 = arith.andi %34, %36 : vector<1x256xi1>
    %38 = arith.extui %37 : vector<1x256xi1> to vector<1x256xi32>
    %39 = arith.sitofp %38 : vector<1x256xi32> to vector<1x256xf32>
    %40 = vector.broadcast %39 : vector<1x256xf32> to vector<4x256xf32>
    %41 = arith.mulf %32, %40 : vector<4x256xf32>
    %c2 = arith.constant 2 : index
    %c0_14 = arith.constant 0 : index
    %c0_15 = arith.constant 0 : index
    %42 = vector.load %arg2[%c2, %c0_14, %c0_15] : memref<9x8x4xbf16, #tpu.memory_space<vmem>>, vector<1x8x4xbf16>
    %43 = vector.shape_cast %42 : vector<1x8x4xbf16> to vector<8x4xbf16>
    %44 = arith.truncf %41 : vector<4x256xf32> to vector<4x256xbf16>
    %cst_16 = arith.constant dense<0.000000e+00> : vector<8x256xf32>
    %45 = tpu.matmul %43, %44, %cst_16 {dimension_numbers = #tpu.dot_dimension_numbers<[1], [0], [0], [1], [0, 0, 1, 1], [], []>} : vector<8x4xbf16>, vector<4x256xbf16>, vector<8x256xf32> -> vector<8x256xf32>
    %46 = arith.addf %31, %45 : vector<8x256xf32>
    %c1_i32_17 = arith.constant 1 : i32
    %47 = tpu.dynamic_rotate %1 by %c1_i32_17 dim 1 : vector<4x256xf32>, i32 -> vector<4x256xf32>
    %c1_i32_18 = arith.constant 1 : i32
    %48 = vector.broadcast %c1_i32_18 : i32 to vector<1x256xi32>
    %49 = arith.cmpi sge, %3, %48 : vector<1x256xi32>
    %50 = arith.extui %49 : vector<1x256xi1> to vector<1x256xi32>
    %51 = arith.sitofp %50 : vector<1x256xi32> to vector<1x256xf32>
    %52 = vector.broadcast %51 : vector<1x256xf32> to vector<4x256xf32>
    %53 = arith.mulf %47, %52 : vector<4x256xf32>
    %c3 = arith.constant 3 : index
    %c0_19 = arith.constant 0 : index
    %c0_20 = arith.constant 0 : index
    %54 = vector.load %arg2[%c3, %c0_19, %c0_20] : memref<9x8x4xbf16, #tpu.memory_space<vmem>>, vector<1x8x4xbf16>
    %55 = vector.shape_cast %54 : vector<1x8x4xbf16> to vector<8x4xbf16>
    %56 = arith.truncf %53 : vector<4x256xf32> to vector<4x256xbf16>
    %cst_21 = arith.constant dense<0.000000e+00> : vector<8x256xf32>
    %57 = tpu.matmul %55, %56, %cst_21 {dimension_numbers = #tpu.dot_dimension_numbers<[1], [0], [0], [1], [0, 0, 1, 1], [], []>} : vector<8x4xbf16>, vector<4x256xbf16>, vector<8x256xf32> -> vector<8x256xf32>
    %58 = arith.addf %46, %57 : vector<8x256xf32>
    %c4 = arith.constant 4 : index
    %c0_22 = arith.constant 0 : index
    %c0_23 = arith.constant 0 : index
    %59 = vector.load %arg2[%c4, %c0_22, %c0_23] : memref<9x8x4xbf16, #tpu.memory_space<vmem>>, vector<1x8x4xbf16>
    %60 = vector.shape_cast %59 : vector<1x8x4xbf16> to vector<8x4xbf16>
    %61 = arith.truncf %1 : vector<4x256xf32> to vector<4x256xbf16>
    %cst_24 = arith.constant dense<0.000000e+00> : vector<8x256xf32>
    %62 = tpu.matmul %60, %61, %cst_24 {dimension_numbers = #tpu.dot_dimension_numbers<[1], [0], [0], [1], [0, 0, 1, 1], [], []>} : vector<8x4xbf16>, vector<4x256xbf16>, vector<8x256xf32> -> vector<8x256xf32>
    %63 = arith.addf %58, %62 : vector<8x256xf32>
    %c255_i32 = arith.constant 255 : i32
    %64 = tpu.dynamic_rotate %1 by %c255_i32 dim 1 : vector<4x256xf32>, i32 -> vector<4x256xf32>
    %c14_i32_25 = arith.constant 14 : i32
    %65 = vector.broadcast %c14_i32_25 : i32 to vector<1x256xi32>
    %66 = arith.cmpi sle, %3, %65 : vector<1x256xi32>
    %67 = arith.extui %66 : vector<1x256xi1> to vector<1x256xi32>
    %68 = arith.sitofp %67 : vector<1x256xi32> to vector<1x256xf32>
    %69 = vector.broadcast %68 : vector<1x256xf32> to vector<4x256xf32>
    %70 = arith.mulf %64, %69 : vector<4x256xf32>
    %c5 = arith.constant 5 : index
    %c0_26 = arith.constant 0 : index
    %c0_27 = arith.constant 0 : index
    %71 = vector.load %arg2[%c5, %c0_26, %c0_27] : memref<9x8x4xbf16, #tpu.memory_space<vmem>>, vector<1x8x4xbf16>
    %72 = vector.shape_cast %71 : vector<1x8x4xbf16> to vector<8x4xbf16>
    %73 = arith.truncf %70 : vector<4x256xf32> to vector<4x256xbf16>
    %cst_28 = arith.constant dense<0.000000e+00> : vector<8x256xf32>
    %74 = tpu.matmul %72, %73, %cst_28 {dimension_numbers = #tpu.dot_dimension_numbers<[1], [0], [0], [1], [0, 0, 1, 1], [], []>} : vector<8x4xbf16>, vector<4x256xbf16>, vector<8x256xf32> -> vector<8x256xf32>
    %75 = arith.addf %63, %74 : vector<8x256xf32>
    %c241_i32 = arith.constant 241 : i32
    %76 = tpu.dynamic_rotate %1 by %c241_i32 dim 1 : vector<4x256xf32>, i32 -> vector<4x256xf32>
    %c240_i32 = arith.constant 240 : i32
    %77 = vector.broadcast %c240_i32 : i32 to vector<1x256xi32>
    %78 = arith.cmpi slt, %2, %77 : vector<1x256xi32>
    %c1_i32_29 = arith.constant 1 : i32
    %79 = vector.broadcast %c1_i32_29 : i32 to vector<1x256xi32>
    %80 = arith.cmpi sge, %3, %79 : vector<1x256xi32>
    %81 = arith.andi %78, %80 : vector<1x256xi1>
    %82 = arith.extui %81 : vector<1x256xi1> to vector<1x256xi32>
    %83 = arith.sitofp %82 : vector<1x256xi32> to vector<1x256xf32>
    %84 = vector.broadcast %83 : vector<1x256xf32> to vector<4x256xf32>
    %85 = arith.mulf %76, %84 : vector<4x256xf32>
    %c6 = arith.constant 6 : index
    %c0_30 = arith.constant 0 : index
    %c0_31 = arith.constant 0 : index
    %86 = vector.load %arg2[%c6, %c0_30, %c0_31] : memref<9x8x4xbf16, #tpu.memory_space<vmem>>, vector<1x8x4xbf16>
    %87 = vector.shape_cast %86 : vector<1x8x4xbf16> to vector<8x4xbf16>
    %88 = arith.truncf %85 : vector<4x256xf32> to vector<4x256xbf16>
    %cst_32 = arith.constant dense<0.000000e+00> : vector<8x256xf32>
    %89 = tpu.matmul %87, %88, %cst_32 {dimension_numbers = #tpu.dot_dimension_numbers<[1], [0], [0], [1], [0, 0, 1, 1], [], []>} : vector<8x4xbf16>, vector<4x256xbf16>, vector<8x256xf32> -> vector<8x256xf32>
    %90 = arith.addf %75, %89 : vector<8x256xf32>
    %c240_i32_33 = arith.constant 240 : i32
    %91 = tpu.dynamic_rotate %1 by %c240_i32_33 dim 1 : vector<4x256xf32>, i32 -> vector<4x256xf32>
    %c240_i32_34 = arith.constant 240 : i32
    %92 = vector.broadcast %c240_i32_34 : i32 to vector<1x256xi32>
    %93 = arith.cmpi slt, %2, %92 : vector<1x256xi32>
    %94 = arith.extui %93 : vector<1x256xi1> to vector<1x256xi32>
    %95 = arith.sitofp %94 : vector<1x256xi32> to vector<1x256xf32>
    %96 = vector.broadcast %95 : vector<1x256xf32> to vector<4x256xf32>
    %97 = arith.mulf %91, %96 : vector<4x256xf32>
    %c7 = arith.constant 7 : index
    %c0_35 = arith.constant 0 : index
    %c0_36 = arith.constant 0 : index
    %98 = vector.load %arg2[%c7, %c0_35, %c0_36] : memref<9x8x4xbf16, #tpu.memory_space<vmem>>, vector<1x8x4xbf16>
    %99 = vector.shape_cast %98 : vector<1x8x4xbf16> to vector<8x4xbf16>
    %100 = arith.truncf %97 : vector<4x256xf32> to vector<4x256xbf16>
    %cst_37 = arith.constant dense<0.000000e+00> : vector<8x256xf32>
    %101 = tpu.matmul %99, %100, %cst_37 {dimension_numbers = #tpu.dot_dimension_numbers<[1], [0], [0], [1], [0, 0, 1, 1], [], []>} : vector<8x4xbf16>, vector<4x256xbf16>, vector<8x256xf32> -> vector<8x256xf32>
    %102 = arith.addf %90, %101 : vector<8x256xf32>
    %c239_i32 = arith.constant 239 : i32
    %103 = tpu.dynamic_rotate %1 by %c239_i32 dim 1 : vector<4x256xf32>, i32 -> vector<4x256xf32>
    %c240_i32_38 = arith.constant 240 : i32
    %104 = vector.broadcast %c240_i32_38 : i32 to vector<1x256xi32>
    %105 = arith.cmpi slt, %2, %104 : vector<1x256xi32>
    %c14_i32_39 = arith.constant 14 : i32
    %106 = vector.broadcast %c14_i32_39 : i32 to vector<1x256xi32>
    %107 = arith.cmpi sle, %3, %106 : vector<1x256xi32>
    %108 = arith.andi %105, %107 : vector<1x256xi1>
    %109 = arith.extui %108 : vector<1x256xi1> to vector<1x256xi32>
    %110 = arith.sitofp %109 : vector<1x256xi32> to vector<1x256xf32>
    %111 = vector.broadcast %110 : vector<1x256xf32> to vector<4x256xf32>
    %112 = arith.mulf %103, %111 : vector<4x256xf32>
    %c8 = arith.constant 8 : index
    %c0_40 = arith.constant 0 : index
    %c0_41 = arith.constant 0 : index
    %113 = vector.load %arg2[%c8, %c0_40, %c0_41] : memref<9x8x4xbf16, #tpu.memory_space<vmem>>, vector<1x8x4xbf16>
    %114 = vector.shape_cast %113 : vector<1x8x4xbf16> to vector<8x4xbf16>
    %115 = arith.truncf %112 : vector<4x256xf32> to vector<4x256xbf16>
    %cst_42 = arith.constant dense<0.000000e+00> : vector<8x256xf32>
    %116 = tpu.matmul %114, %115, %cst_42 {dimension_numbers = #tpu.dot_dimension_numbers<[1], [0], [0], [1], [0, 0, 1, 1], [], []>} : vector<8x4xbf16>, vector<4x256xbf16>, vector<8x256xf32> -> vector<8x256xf32>
    %117 = arith.addf %102, %116 : vector<8x256xf32>
    %c0_43 = arith.constant 0 : index
    %c0_44 = arith.constant 0 : index
    %118 = vector.load %arg3[%c0_43, %c0_44] : memref<8x1xf32, #tpu.memory_space<vmem>>, vector<8x1xf32>
    %119 = vector.broadcast %118 : vector<8x1xf32> to vector<8x256xf32>
    %120 = arith.mulf %117, %119 : vector<8x256xf32>
    %c0_45 = arith.constant 0 : index
    %c0_46 = arith.constant 0 : index
    %121 = vector.load %arg4[%c0_45, %c0_46] : memref<8x1xf32, #tpu.memory_space<vmem>>, vector<8x1xf32>
    %122 = vector.broadcast %121 : vector<8x1xf32> to vector<8x256xf32>
    %123 = arith.addf %120, %122 : vector<8x256xf32>
    %cst_47 = arith.constant 0.000000e+00 : f32
    %124 = vector.broadcast %cst_47 : f32 to vector<8x256xf32>
    %125 = arith.maximumf %123, %124 : vector<8x256xf32>
    %c0_48 = arith.constant 0 : index
    %c0_49 = arith.constant 0 : index
    %c0_50 = arith.constant 0 : index
    %126 = vector.load %arg6[%c0_48, %c0_49, %c0_50] : memref<1x8x256xf32, #tpu.memory_space<vmem>>, vector<1x8x256xf32>
    %127 = vector.shape_cast %126 : vector<1x8x256xf32> to vector<8x256xf32>
    %128 = vector.shape_cast %125 : vector<8x256xf32> to vector<1x8x256xf32>
    tpu.vector_store %arg6[%c0_48, %c0_49, %c0_50], %128 {strides = array<i32>} : memref<1x8x256xf32, #tpu.memory_space<vmem>>, vector<1x8x256xf32>,
    return
  }
  func.func @transform_0(%arg0: i32) -> (i32, i32, i32) {
    %c0_i32 = arith.constant 0 : i32
    %c0_i32_0 = arith.constant 0 : i32
    %c0_i32_1 = arith.constant 0 : i32
    return %arg0, %c0_i32, %c0_i32_0 : i32, i32, i32
  }
  func.func @transform_1(%arg0: i32) -> (i32, i32, i32) {
    %c0_i32 = arith.constant 0 : i32
    %c0_i32_0 = arith.constant 0 : i32
    %c0_i32_1 = arith.constant 0 : i32
    %c0_i32_2 = arith.constant 0 : i32
    return %c0_i32, %c0_i32_0, %c0_i32_1 : i32, i32, i32
  }
  func.func @transform_2(%arg0: i32) -> (i32, i32) {
    %c0_i32 = arith.constant 0 : i32
    %c0_i32_0 = arith.constant 0 : i32
    %c0_i32_1 = arith.constant 0 : i32
    return %c0_i32, %c0_i32_0 : i32, i32
  }
  func.func @transform_3(%arg0: i32) -> (i32, i32) {
    %c0_i32 = arith.constant 0 : i32
    %c0_i32_0 = arith.constant 0 : i32
    %c0_i32_1 = arith.constant 0 : i32
    return %c0_i32, %c0_i32_0 : i32, i32
  }
  func.func @transform_4(%arg0: i32) -> (i32, i32) {
    %c0_i32 = arith.constant 0 : i32
    %c0_i32_0 = arith.constant 0 : i32
    %c0_i32_1 = arith.constant 0 : i32
    return %c0_i32, %c0_i32_0 : i32, i32
  }
  func.func @transform_5(%arg0: i32) -> (i32, i32, i32) {
    %c0_i32 = arith.constant 0 : i32
    %c0_i32_0 = arith.constant 0 : i32
    %c0_i32_1 = arith.constant 0 : i32
    return %arg0, %c0_i32, %c0_i32_0 : i32, i32, i32
  }
}

</mosaic_0001>

<bundles_post_ra>
// kernel: tile.9
= control target key start
LH: loop header
LB: loop body
LE: loop exit
PB: predicated region body
PF: predicated region fallthrough
CT: control target
= control target key end

     0   :  { %s7_s6 = smov 3  ;;  %s21_s9 = smov 3  ;;  %vm4_vm0 = vcmask 130048   ;;  %vm11_vm1 = vcmask 1048448   ;;  %vm18_vm2 = vcmask 917248   ;;  %vm25_vm3 = vcmask 786048   ;;  %s131_s0 = inlined_call_operand.vmem [shape: s32[16,16], index: 0, kind: input, shape index: {}]   ;;  %s132_s1 = inlined_call_operand.vmem [shape: s32[1,256], index: 1, kind: output, shape index: {}]  }
   0x1   :  { %v69_v0 = vld [vmem:[%s131_s0 + $0x7] ss:$8 sm:%s7_s6]   ;;  %s84_s10 = smov 112   ;;  %v71_v1 = vld [vmem:[%s131_s0 + $0x5] ss:$8 sm:%s21_s9]   ;;  %s14_s13 = smov 3 }
   0x2   :  { %9 = vrot.lane.b32.xlu0 %v69_v0, %s84_s10  ;;  %s85_s14 = smov 80   ;;  %v70_v2 = vld [vmem:[%s131_s0 + $0x6] ss:$8 sm:%s14_s13]   ;;  %s28_s17 = smov 3  ;;  %vm32_vm4 = vcmask 654848   ;;  %vm39_vm5 = vcmask 523648  }
   0x3   :  { %23 = vrot.lane.b32.xlu1 %v71_v1, %s85_s14  ;;  %v72_v3 = vld [vmem:[%s131_s0 + $0x4] ss:$8 sm:%s28_s17]   ;;  %s35_s20 = smov 3  ;;  %s42_s21 = smov 3  ;;  %vm46_vm6 = vcmask 392448   ;;  %vm53_vm7 = vcmask 261248  }
   0x4   :  { %s86_s22 = smov 96   ;;  %s87_s23 = smov 64   ;;  %v73_v4 = vld [vmem:[%s131_s0 + $0x3] ss:$8 sm:%s35_s20]   ;;  %v74_v5 = vld [vmem:[%s131_s0 + $0x2] ss:$8 sm:%s42_s21]  }
   0x5   :  { %s2_s26 = smov 3  ;;  %s49_s29 = smov 3 }
   0x6   :  { %16 = vrot.lane.b32.xlu0 %v70_v2, %s86_s22  ;;  %v3_v6 = vld [vmem:[%s131_s0] ss:$8 sm:%s2_s26]   ;;  %s88_s3 = smov 48   ;;  %s89_s4 = smov 32  }
   0x7   :  { %30 = vrot.lane.b32.xlu1 %v72_v3, %s87_s23  ;;  %5 = vst.msk [vmem:[#allocation0] ss:$8 sm:$0x3] %vm4_vm0, %v3_v6   ;;  %v75_v7 = vld [vmem:[%s131_s0 + $0x1] ss:$8 sm:%s49_s29]   ;;  %s90_s0 = smov 16  }
   0xa   :  { %37 = vrot.lane.b32.xlu0 %v73_v4, %s88_s3 }
   0xb   :  { %44 = vrot.lane.b32.xlu1 %v74_v5, %s89_s4 }
   0xe   :  { %51 = vrot.lane.b32.xlu0 %v75_v7, %s90_s0 }
  0x74   :  { %v10_v8 = vpop.permute.xlu0 %9  }
  0x75   :  { %12 = vst.msk [vmem:[#allocation0] ss:$8 sm:$0x3] %vm11_vm1, %v10_v8   ;;  %v24_v9 = vpop.permute.xlu1 %23  }
  0x78   :  { %v17_v10 = vpop.permute.xlu0 %16  }
  0x79   :  { %19 = vst.msk [vmem:[#allocation0] ss:$8 sm:$0x3] %vm18_vm2, %v17_v10   ;;  %v31_v11 = vpop.permute.xlu1 %30  }
  0x7a   :  { %26 = vst.msk [vmem:[#allocation0] ss:$8 sm:$0x3] %vm25_vm3, %v24_v9  }
  0x7b   :  { %33 = vst.msk [vmem:[#allocation0] ss:$8 sm:$0x3] %vm32_vm4, %v31_v11  }
  0x7c   :  { %v38_v12 = vpop.permute.xlu0 %37  }
  0x7d   :  { %40 = vst.msk [vmem:[#allocation0] ss:$8 sm:$0x3] %vm39_vm5, %v38_v12   ;;  %v45_v13 = vpop.permute.xlu1 %44  }
  0x7e   :  { %47 = vst.msk [vmem:[#allocation0] ss:$8 sm:$0x3] %vm46_vm6, %v45_v13  }
  0x80   :  { %v52_v14 = vpop.permute.xlu0 %51  }
  0x81   :  { %54 = vst.msk [vmem:[#allocation0] ss:$8 sm:$0x3] %vm53_vm7, %v52_v14  }
  0x88   :  { %v59_v15 = vld [vmem:[#allocation0] sm:$0x1]  ;;  %v64_v16 = vld [vmem:[#allocation0 + $0x8] sm:$0x1] }
  0x89   :  { %62 = vst [vmem:[%s132_s1] sm:$0x1] %v59_v15  ;;  %76 = vst [vmem:[%s132_s1 + $0x1] sm:$0x1] %v64_v16 }

// kernel: seg_block_pallas.1
= control target key start
LH: loop header
LB: loop body
LE: loop exit
PB: predicated region body
PF: predicated region fallthrough
CT: control target
= control target key end

     0   :  { %s1118_s18 = smov 0   ;;  %s1352_s0 = inlined_call_operand.vmem [shape: f32[2,4,256], index: 0, kind: input, shape index: {}]   ;;  %s1353_s1 = inlined_call_operand.vmem [shape: bf16[9,8,4], index: 1, kind: input, shape index: {}]   ;;  %s1354_s2 = inlined_call_operand.vmem [shape: f32[8,1], index: 2, kind: input, shape index: {}]   ;;  %s1355_s3 = inlined_call_operand.vmem [shape: f32[8,1], index: 3, kind: input, shape index: {}]   ;;  %s1356_s4 = inlined_call_operand.vmem [shape: s32[1,256], index: 4, kind: input, shape index: {}]   ;;  %s1357_s5 = inlined_call_operand.vmem [shape: f32[2,8,256], index: 5, kind: output, shape index: {}]  }
   0x1 LB: > { %s998_s19 = sadd.s32 4294967295, %s1076_s18   ;;  %p1002_p0 = scmp.ge.s32.totalorder %s1076_s18, 1  ;;  %s1076_s18 = sphi %s1118_s18, %s15_s18  }
   0x2   : > { %p187_p1 = scmp.lt.s32.totalorder %s1076_s18, 3 }
   0x4   : > { %p188_p2 = pnand %p1002_p0, %p187_p1 }
   0x5   : > { %p215_p3 = scmp.lt.s32.totalorder (!%p188_p2), %s998_s19, 1  ;;  %s1079_s24 = smov (!%p188_p2), 17  }
   0x6   : > { %191 = sbr.rel (%p188_p2) target bundleno = 379 (0x17b), region = 40  ;;  %s1080_s25 = smov (!%p188_p2), 16  }
   0x7   : > { %s1081_s26 = smov (!%p188_p2), 15   ;;  %s1082_s27 = smov (!%p188_p2), 1  }
   0x8   : > { %s1083_s28 = smov (!%p188_p2), 127   ;;  %s1084_s29 = smov (!%p188_p2), 113  }
   0x9   : > { %s1085_s30 = smov (!%p188_p2), 112   ;;  %s1086_s6 = smov (!%p188_p2), 111  }
   0xb   : > { %v1078_v0 = vmov 0   ;;  %s1367_s19 = smov (!%p215_p3, %s998_s19), 1  ;;  %v923_v3 = vld [vmem:[%s1354_s2] sm:$0xff]  ;;  %v227_v5 = vlaneseq  ;;  %v1087_v21 = vmov 0.0   ;;  %vm295_vm11 = vcmask 1041408  }
   0xc   : > { %334 = vmatprep.mubr.bf16.mxu0 %v1078_v0  ;;  %384 = vmatprep.mubr.bf16.mxu1 %v1078_v0  ;;  %s1047_s20 = sshll.u32 %s1367_s19, 3  ;;  %v931_v4 = vld [vmem:[%s1355_s3] sm:$0xff]  ;;  %vm291_vm15 = vcmask 31744   ;;  %s1048_s8 = sshll.u32 %s1367_s19, 4 }
   0xd   : > { %1067 = vset.pattern.permute.xlu0 %v1078_v0  ;;  %1068 = vset.pattern.permute.xlu1 %v1078_v0  ;;  %s219_s23 = scalar_lea.vmem %s1352_s0, %s1047_s20  ;;  %v230_v6 = vld [vmem:[%s1356_s4] sm:$0x3]  ;;  %v246_v7 = vshrl.u32 %v227_v5, 7  ;;  %v1175_v12 = vand.u32 127, %v227_v5  ;;  %v1010_v59 = vld [vmem:[%s1353_s1 + $0x4] sm:$0xf]  ;;  %s224_s11 = scalar_lea.vmem %s1357_s5, %s1048_s8 }
   0xe   : > { %v1136_v1 = vld [vmem:[%s219_s23] sm:$0xff]  ;;  %vm243_vm0 = vcmp.ge.s32.totalorder %v230_v6, 1  ;;  %vm400_vm1 = vcmp.le.s32.totalorder %v230_v6, 14 }
   0xf   : > { %234 = vrot.lane.b32.xlu1 %v1136_v1, %s1079_s24  ;;  %274 = vrot.lane.b32.xlu0 %v1136_v1, %s1080_s25  ;;  %v1142_v2 = vcombine.high %v1136_v1, %v1136_v1  ;;  %v1167_v8 = vsub.s32 0, %v246_v7  ;;  %v244_v9 = vsel %vm243_vm0, 1, %v1078_v0  ;;  %v1171_v10 = vsub.s32 1, %v246_v7  ;;  %v271_v60 = vld [vmem:[%s1353_s1] sm:$0xf] }
  0x10   : > { %v401_v11 = vsel %vm400_vm1, 1, %v1078_v0  ;;  %vm241_vm2 = vcmp.ge.s32.totalorder %v1175_v12, 16  ;;  %vm238_vm9 = vcmp.lt.s32.totalorder %v1175_v12, 17  ;;  %vm278_vm10 = vcmp.lt.s32.totalorder %v1175_v12, 16 }
  0x11   : > { %v248_v13 = vrot.slane %v244_v9, %v1167_v8  ;;  %v405_v14 = vrot.slane %v401_v11, %v1167_v8  ;;  %v252_v15 = vrot.slane %v244_v9, %v1171_v10  ;;  %v409_v17 = vrot.slane %v401_v11, %v1171_v10 }
  0x12   : > { %v1009_v30 = vsel %vm241_vm2, 1.0, %v1087_v21  ;;  %vm397_vm12 = vcmp.lt.s32.totalorder %v1175_v12, 15  ;;  %v1020_v35 = vsel %vm243_vm0, 1.0, %v1087_v21  ;;  %v1227_v36 = vadd.s32 128, %v1175_v12 }
  0x13   : > { %236 = vrot.lane.b32.xlu1 %v1142_v2, %s1079_s24  ;;  %276 = vrot.lane.b32.xlu0 %v1142_v2, %s1080_s25  ;;  %vm1181_vm3 = vcmp.ne.s32.totalorder %v248_v13, 0  ;;  %vm1186_vm4 = vcmp.ne.s32.totalorder %v405_v14, 0  ;;  %vm1194_vm6 = vcmp.ne.s32.totalorder %v252_v15, 0  ;;  %vm1198_vm7 = vcmp.ne.s32.totalorder %v409_v17, 0 }
  0x14   : > { %vm255_vm5 = vmand %vm241_vm2, %vm1181_vm3  ;;  %v1008_v23 = vsel %vm1194_vm6, 1.0, %v1087_v21  ;;  %v1016_v27 = vsel %vm1198_vm7, 1.0, %v1087_v21  ;;  %vm488_vm13 = vcmp.lt.s32.totalorder %v1175_v12, 1  ;;  %v496_v45 = vrot.slane %v1020_v35, %v1167_v8 }
  0x15   : > { %vm412_vm8 = vmand %vm241_vm2, %vm1186_vm4  ;;  %v1007_v22 = vsel %vm255_vm5, 1.0, %v1087_v21  ;;  %v268_v29 = vrot.slane %v1008_v23, %v1167_v8  ;;  %v425_v34 = vrot.slane %v1016_v27, %v1167_v8  ;;  %v500_v51 = vrot.slane %v1020_v35, %v1171_v10 }
  0x16   : > { %v1015_v26 = vsel %vm412_vm8, 1.0, %v1087_v21  ;;  %v264_v28 = vrot.slane %v1007_v22, %v1167_v8  ;;  %v1027_v54 = vsel %vm400_vm1, 1.0, %v1087_v21  ;;  %vm702_vm14 = vcmp.lt.s32.totalorder %v1227_v36, 240 }
  0x17   : > { %395 = vrot.lane.b32.xlu1 %v1142_v2, %s1081_s26  ;;  %393 = vrot.lane.b32.xlu0 %v1136_v1, %s1081_s26  ;;  %v421_v33 = vrot.slane %v1015_v26, %v1167_v8  ;;  %vm621_vm0 = vcmp.lt.s32.totalorder %v1175_v12, 127  ;;  %vm704_vm1 = vmand %vm702_vm14, %vm1194_vm6  ;;  %v633_v7 = vrot.slane %v1027_v54, %v1171_v10  ;;  %v564_v9 = vpack.c.bf16 %v1142_v2, %v1142_v2 }
  0x18   : > { %v1031_v15 = vsel %vm1181_vm3, 1.0, %v1087_v21  ;;  %v1032_v10 = vsel %vm704_vm1, 1.0, %v1087_v21  ;;  %v563_v23 = vpack.c.bf16 %v1136_v1, %v1136_v1  ;;  %vm698_vm2 = vcmp.lt.s32.totalorder %v1175_v12, 113  ;;  %vm852_vm3 = vmand %vm702_vm14, %vm1198_vm7 }
  0x19   : > { %vm779_vm5 = vcmp.lt.s32.totalorder %v1175_v12, 112  ;;  %v1036_v20 = vsel %vm702_vm14, 1.0, %v1087_v21  ;;  %vm848_vm6 = vcmp.lt.s32.totalorder %v1175_v12, 111 }
  0x1a   : > { %v569_v35 = vsel %vm295_vm11, %v563_v23, 0 }
  0x1b   : > { %486 = vrot.lane.b32.xlu1 %v1142_v2, %s1082_s27  ;;  %484 = vrot.lane.b32.xlu0 %v1136_v1, %s1082_s27 }
  0x1f   : > { %619 = vrot.lane.b32.xlu1 %v1142_v2, %s1083_s28  ;;  %617 = vrot.lane.b32.xlu0 %v1136_v1, %s1083_s28 }
  0x23   : > { %696 = vrot.lane.b32.xlu1 %v1142_v2, %s1084_s29  ;;  %694 = vrot.lane.b32.xlu0 %v1136_v1, %s1084_s29 }
  0x27   : > { %777 = vrot.lane.b32.xlu1 %v1142_v2, %s1085_s30  ;;  %775 = vrot.lane.b32.xlu0 %v1136_v1, %s1085_s30 }
  0x2b   : > { %846 = vrot.lane.b32.xlu1 %v1142_v2, %s1086_s6  ;;  %844 = vrot.lane.b32.xlu0 %v1136_v1, %s1086_s6  ;;  %v716_v1 = vrot.slane %v1032_v10, %v1167_v8 }
  0x2f   : > { %926 = vperm.xlu0 %1067, %v923_v3   ;;  %934 = vperm.xlu1 %1068, %v931_v4   ;;  %v629_v4 = vrot.slane %v1027_v54, %v1167_v8 }
  0x81   : > { %v235_v24 = vpop.permute.xlu1 %234  ;;  %v275_v25 = vpop.permute.xlu0 %274 }
  0x85   : > { %v237_v31 = vpop.permute.xlu1 %236  ;;  %v277_v32 = vpop.permute.xlu0 %276 }
  0x86   : > { %v239_v37 = vsel %vm238_vm9, %v235_v24, %v237_v31  ;;  %v240_v38 = vsel %vm238_vm9, %v237_v31, %v235_v24  ;;  %v280_v39 = vsel %vm278_vm10, %v277_v32, %v275_v25  ;;  %v279_v40 = vsel %vm278_vm10, %v275_v25, %v277_v32 }
  0x87   : > { %v269_v41 = vmul.f32 %v264_v28, %v240_v38  ;;  %v285_v42 = vmul.f32 %v1009_v30, %v280_v39  ;;  %v290_v43 = vpack.c.bf16 %v279_v40, %v279_v40  ;;  %v270_v44 = vmul.f32 %v268_v29, %v239_v37  ;;  %v1017_v29 = vld [vmem:[%s1353_s1 + $0x8] sm:$0xf]  ;;  %v1021_v30 = vld [vmem:[%s1353_s1 + $0xc] sm:$0xf] }
  0x88   : > { %v712_v25 = vrot.slane %v1031_v15, %v1167_v8 }
  0x89   : > { %v396_v46 = vpop.permute.xlu1 %395  ;;  %1011 = vmatprep.subr.msk.bf16.mxu0 %vm295_vm11, %v290_v43  ;;  %v394_v47 = vpop.permute.xlu0 %393  ;;  %v273_v48 = vpack.c.bf16 %v270_v44, %v270_v44  ;;  %v289_v49 = vpack.c.bf16 %v285_v42, %v285_v42  ;;  %v272_v50 = vpack.c.bf16 %v269_v41, %v269_v41  ;;  %v1040_v42 = vsel %vm1186_vm4, 1.0, %v1087_v21 }
  0x8a   : > { %v398_v52 = vsel %vm397_vm12, %v394_v47, %v396_v46  ;;  %v399_v53 = vsel %vm397_vm12, %v396_v46, %v394_v47  ;;  %v1041_v43 = vsel %vm852_vm3, 1.0, %v1087_v21  ;;  %v860_v18 = vrot.slane %v1040_v42, %v1167_v8 }
  0x8b   : > { %v426_v55 = vmul.f32 %v421_v33, %v399_v53  ;;  %v427_v56 = vmul.f32 %v425_v34, %v398_v52  ;;  %1013 = vmatprep.subr.msk.bf16.mxu1 %vm295_vm11, %v273_v48  ;;  %v297_v57 = vsel %vm295_vm11, %v289_v49, 0  ;;  %v347_v58 = vsel %vm295_vm11, %v272_v50, 0  ;;  %v1028_v52 = vld [vmem:[%s1353_s1 + $0x14] sm:$0xf] }
  0x8c   : > { %317 = vmatpush1.bf16.msra.mxu0 %v297_v57  ;;  %367 = vmatpush1.bf16.msra.mxu1 %v347_v58  ;;  %v864_v21 = vrot.slane %v1041_v43, %v1167_v8 }
  0x8d   : > { %v430_v61 = vpack.c.bf16 %v426_v55, %v426_v55  ;;  %v431_v62 = vpack.c.bf16 %v427_v56, %v427_v56  ;;  %v487_v63 = vpop.permute.xlu1 %486  ;;  %v485_v3 = vpop.permute.xlu0 %484 }
  0x8e   : > { %v489_v5 = vsel %vm488_vm13, %v485_v3, %v487_v63  ;;  %v490_v6 = vsel %vm488_vm13, %v487_v63, %v485_v3  ;;  %v1037_v63 = vld [vmem:[%s1353_s1 + $0x1c] sm:$0xf] }
  0x8f   : > { %v503_v11 = vmul.f32 %v496_v45, %v490_v6  ;;  %v504_v13 = vmul.f32 %v500_v51, %v489_v5  ;;  %1012 = vmatmul.mubr.msk.bf16.vlgmr.msra.gmra.mxu0 %vm291_vm15, %v1010_v59  ;;  %1014 = vmatmul.mubr.msk.bf16.vlgmr.msra.gmra.mxu1 %vm291_vm15, %v271_v60  ;;  %v436_v14 = vsel %vm295_vm11, %v430_v61, 0  ;;  %v1024_v51 = vld [vmem:[%s1353_s1 + $0x10] sm:$0xf] }
  0x90   : > { %1018 = vmatprep.subr.msk.bf16.mxu0 %vm295_vm11, %v431_v62  ;;  %473 = vmatprep.mubr.bf16.mxu0 %v1078_v0  ;;  %v1033_v62 = vld [vmem:[%s1353_s1 + $0x18] sm:$0xf] }
  0x91   : > { %v507_v17 = vpack.c.bf16 %v503_v11, %v503_v11  ;;  %v508_v2 = vpack.c.bf16 %v504_v13, %v504_v13  ;;  %456 = vmatpush1.bf16.msra.mxu0 %v436_v14  ;;  %v620_v19 = vpop.permute.xlu1 %619  ;;  %v618_v22 = vpop.permute.xlu0 %617  ;;  %550 = vmatprep.mubr.bf16.mxu1 %v1078_v0 }
  0x92   : > { %v622_v16 = vsel %vm621_vm0, %v618_v22, %v620_v19  ;;  %v623_v24 = vsel %vm621_vm0, %v620_v19, %v618_v22  ;;  %1025 = vmatprep.subr.msk.bf16.mxu0 %vm295_vm11, %v564_v9 }
  0x93   : > { %v636_v26 = vmul.f32 %v629_v4, %v622_v16  ;;  %v637_v27 = vmul.f32 %v633_v7, %v623_v24  ;;  %1022 = vmatprep.subr.msk.bf16.mxu1 %vm295_vm11, %v508_v2  ;;  %v513_v28 = vsel %vm295_vm11, %v507_v17, 0  ;;  %v1042_v4 = vld [vmem:[%s1353_s1 + $0x20] sm:$0xf] }
  0x94   : > { %533 = vmatpush1.bf16.msra.mxu1 %v513_v28 }
  0x95   : > { %v640_v31 = vpack.c.bf16 %v636_v26, %v636_v26  ;;  %v641_v32 = vpack.c.bf16 %v637_v27, %v637_v27  ;;  %v697_v33 = vpop.permute.xlu1 %696  ;;  %v695_v34 = vpop.permute.xlu0 %694 }
  0x96   : > { %v699_v37 = vsel %vm698_vm2, %v695_v34, %v697_v33  ;;  %v700_v38 = vsel %vm698_vm2, %v697_v33, %v695_v34 }
  0x97   : > { %1019 = vmatmul.mubr.msk.bf16.vlgmr.msra.gmra.mxu0 %vm291_vm15, %v1017_v29  ;;  %v717_v39 = vmul.f32 %v712_v25, %v699_v37  ;;  %v718_v40 = vmul.f32 %v716_v1, %v700_v38  ;;  %1023 = vmatmul.mubr.msk.bf16.vlgmr.msra.gmra.mxu1 %vm291_vm15, %v1021_v30  ;;  %v646_v41 = vsel %vm295_vm11, %v640_v31, 0 }
  0x98   : > { %589 = vmatpush1.bf16.msra.mxu0 %v569_v35  ;;  %1029 = vmatprep.subr.msk.bf16.mxu1 %vm295_vm11, %v641_v32 }
  0x99   : > { %v721_v44 = vpack.c.bf16 %v717_v39, %v717_v39  ;;  %v722_v45 = vpack.c.bf16 %v718_v40, %v718_v40  ;;  %v778_v46 = vpop.permute.xlu1 %777  ;;  %v776_v47 = vpop.permute.xlu0 %775  ;;  %666 = vmatpush1.bf16.msra.mxu1 %v646_v41  ;;  %606 = vmatprep.mubr.bf16.mxu0 %v1078_v0 }
  0x9a   : > { %v780_v48 = vsel %vm779_vm5, %v776_v47, %v778_v46  ;;  %v781_v49 = vsel %vm779_vm5, %v778_v46, %v776_v47  ;;  %683 = vmatprep.mubr.bf16.mxu1 %v1078_v0 }
  0x9b   : > { %v787_v36 = vmul.f32 %v1036_v20, %v781_v49  ;;  %v790_v50 = vpack.c.bf16 %v780_v48, %v780_v48  ;;  %1034 = vmatprep.subr.msk.bf16.mxu0 %vm295_vm11, %v722_v45  ;;  %v727_v54 = vsel %vm295_vm11, %v721_v44, 0 }
  0x9d   : > { %v791_v53 = vpack.c.bf16 %v787_v36, %v787_v36  ;;  %v847_v12 = vpop.permute.xlu1 %846  ;;  %v845_v55 = vpop.permute.xlu0 %844  ;;  %v796_v58 = vsel %vm295_vm11, %v790_v50, 0 }
  0x9e   : > { %v849_v56 = vsel %vm848_vm6, %v845_v55, %v847_v12  ;;  %v850_v57 = vsel %vm848_vm6, %v847_v12, %v845_v55 }
  0x9f   : > { %1026 = vmatmul.mubr.msk.bf16.vlgmr.msra.gmra.mxu0 %vm291_vm15, %v1024_v51  ;;  %1030 = vmatmul.mubr.msk.bf16.vlgmr.msra.gmra.mxu1 %vm291_vm15, %v1028_v52  ;;  %v865_v8 = vmul.f32 %v860_v18, %v849_v56  ;;  %v866_v59 = vmul.f32 %v864_v21, %v850_v57 }
  0xa0   : > { %747 = vmatpush1.bf16.msra.mxu0 %v727_v54  ;;  %1038 = vmatprep.subr.msk.bf16.mxu1 %vm295_vm11, %v791_v53 }
  0xa1   : > { %v869_v60 = vpack.c.bf16 %v865_v8, %v865_v8  ;;  %v870_v61 = vpack.c.bf16 %v866_v59, %v866_v59  ;;  %816 = vmatpush1.bf16.msra.mxu1 %v796_v58  ;;  %764 = vmatprep.mubr.bf16.mxu0 %v1078_v0 }
  0xa2   : > { %833 = vmatprep.mubr.bf16.mxu1 %v1078_v0 }
  0xa3   : > { %1043 = vmatprep.subr.msk.bf16.mxu0 %vm295_vm11, %v870_v61  ;;  %v875_v3 = vsel %vm295_vm11, %v869_v60, 0 }
  0xa7   : > { %1035 = vmatmul.mubr.msk.bf16.vlgmr.msra.gmra.mxu0 %vm291_vm15, %v1033_v62  ;;  %1039 = vmatmul.mubr.msk.bf16.vlgmr.msra.gmra.mxu1 %vm291_vm15, %v1037_v63 }
  0xa8   : > { %895 = vmatpush1.bf16.msra.mxu0 %v875_v3  ;;  %912 = vmatprep.mubr.bf16.mxu0 %v1078_v0 }
  0xaa   : > { %v927_v21 = vpop.permute.xlu0 %926  ;;  %v935_v54 = vpop.permute.xlu1 %934 }
  0xaf   : > { %1044 = vmatmul.mubr.msk.bf16.vlgmr.msra.gmra.mxu0 %vm291_vm15, %v1042_v4 }
 0x14f   : > { %v336_v5 = vpop.f32.mrf.mxu0  ;;  %v386_v6 = vpop.f32.mrf.mxu1 }
 0x150   : > { %v387_v23 = vadd.f32 %v386_v6, %v336_v5 }
 0x151   : > { %v338_v7 = vpop.f32.mrf.mxu0  ;;  %v388_v9 = vpop.f32.mrf.mxu1 }
 0x152   : > { %v389_v25 = vadd.f32 %v388_v9, %v338_v7 }
 0x153   : > { %v340_v11 = vpop.f32.mrf.mxu0  ;;  %v390_v13 = vpop.f32.mrf.mxu1 }
 0x155   : > { %v341_v14 = vpop.f32.mrf.mxu0  ;;  %v391_v15 = vpop.f32.mrf.mxu1 }
 0x157   : > { %v475_v10 = vpop.f32.mrf.mxu0  ;;  %v552_v17 = vpop.f32.mrf.mxu1 }
 0x158   : > { %v482_v26 = vadd.f32 %v475_v10, %v387_v23 }
 0x159   : > { %v477_v2 = vpop.f32.mrf.mxu0  ;;  %v554_v19 = vpop.f32.mrf.mxu1 }
 0x15a   : > { %v483_v1 = vadd.f32 %v477_v2, %v389_v25  ;;  %v559_v31 = vadd.f32 %v552_v17, %v482_v26 }
 0x15b   : > { %v479_v22 = vpop.f32.mrf.mxu0  ;;  %v556_v0 = vpop.f32.mrf.mxu1 }
 0x15c   : > { %v560_v34 = vadd.f32 %v554_v19, %v483_v1 }
 0x15d   : > { %v480_v16 = vpop.f32.mrf.mxu0  ;;  %v557_v24 = vpop.f32.mrf.mxu1 }
 0x15f   : > { %v608_v27 = vpop.f32.mrf.mxu0  ;;  %v685_v28 = vpop.f32.mrf.mxu1 }
 0x160   : > { %v615_v35 = vadd.f32 %v608_v27, %v559_v31 }
 0x161   : > { %v610_v29 = vpop.f32.mrf.mxu0  ;;  %v687_v30 = vpop.f32.mrf.mxu1 }
 0x162   : > { %v616_v39 = vadd.f32 %v610_v29, %v560_v34  ;;  %v692_v20 = vadd.f32 %v685_v28, %v615_v35 }
 0x163   : > { %v612_v32 = vpop.f32.mrf.mxu0  ;;  %v689_v33 = vpop.f32.mrf.mxu1 }
 0x164   : > { %v693_v44 = vadd.f32 %v687_v30, %v616_v39 }
 0x165   : > { %v613_v37 = vpop.f32.mrf.mxu0  ;;  %v690_v38 = vpop.f32.mrf.mxu1 }
 0x167   : > { %v766_v40 = vpop.f32.mrf.mxu0  ;;  %v835_v41 = vpop.f32.mrf.mxu1 }
 0x168   : > { %v773_v45 = vadd.f32 %v766_v40, %v692_v20 }
 0x169   : > { %v768_v42 = vpop.f32.mrf.mxu0  ;;  %v837_v43 = vpop.f32.mrf.mxu1 }
 0x16a   : > { %v774_v48 = vadd.f32 %v768_v42, %v693_v44  ;;  %v842_v50 = vadd.f32 %v835_v41, %v773_v45 }
 0x16b   : > { %v770_v46 = vpop.f32.mrf.mxu0  ;;  %v839_v47 = vpop.f32.mrf.mxu1 }
 0x16c   : > { %v843_v51 = vadd.f32 %v837_v43, %v774_v48 }
 0x16d   : > { %v771_v49 = vpop.f32.mrf.mxu0  ;;  %v840_v36 = vpop.f32.mrf.mxu1 }
 0x16f   : > { %v914_v18 = vpop.f32.mrf.mxu0 }
 0x170   : > { %v921_v52 = vadd.f32 %v914_v18, %v842_v50 }
 0x171   : > { %v916_v53 = vpop.f32.mrf.mxu0 }
 0x172   : > { %v929_v12 = vmul.f32 %v927_v21, %v921_v52  ;;  %v922_v55 = vadd.f32 %v916_v53, %v843_v51 }
 0x173   : > { %v918_v56 = vpop.f32.mrf.mxu0 }
 0x174   : > { %v930_v57 = vmul.f32 %v927_v21, %v922_v55  ;;  %v937_v58 = vadd.f32 %v935_v54, %v929_v12 }
 0x175   : > { %v919_v8 = vpop.f32.mrf.mxu0 }
 0x176   : > { %v938_v59 = vadd.f32 %v935_v54, %v930_v57  ;;  %v939_v60 = vmax.f32 %v937_v58, 0.0 }
 0x178   : > { %v940_v61 = vmax.f32 %v938_v59, 0.0  ;;  %941 = vst [vmem:[%s224_s11] sm:$0xff] %v939_v60 }
 0x17a   : > { %942 = vst [vmem:[%s224_s11 + $0x8] sm:$0xff] %v940_v61 }
 0x17b PF: > { %s15_s18 = sadd.s32 1, %s1076_s18  }
 0x17c   : > { %p12_p4 = scmp.ge.s32.totalorder %s15_s18, 4  }
 0x17e   :  { %14 = sbr.rel (!%p12_p4) target bundleno = 1 (0x1), region = 78 }

</bundles_post_ra>
